<compile_context>
chip_gen: v5e
topology: v5e:2x2
jax: 0.10.0
libtpu: 0.0.40
codegen_flags: <defaults>
</compile_context>

<pallas_src>
import math

import jax
import jax.numpy as jnp
from jax.experimental import pallas as pl
from jax.experimental.pallas import tpu as pltpu

_LANES = 128
_SUBLANES = 8                    # f32 sublane granularity
_MAX_LANE_WIDTH = 1024           # widest flattened lane dimension considered
_TARGET_BLOCK_ELEMS = 1 << 20    # ~4 MiB per f32 buffer per grid step
_VMEM_LIMIT_BYTES = 48 << 20     # 6 x 4 MiB double-buffered blocks ~= 24 MiB; head-room
                                 # raises v5e's 16 MiB default, stays < v7x's 64 MiB


def _res_eventually_kernel(x_ref, y_ref, c_ref, o_ref):
    # Pure VPU elementwise: o = max(x + y + c, 0), with c = 1 - beta folded.
    # The trailing LeakyReLU(0.02) after ReLU is provably the identity.
    o_ref[...] = jnp.maximum(
        x_ref[...] + y_ref[...] + c_ref[...], 0.0
    ).astype(o_ref.dtype)


def _choose_tile_rows(rows, width):
    """Row tile: ~_TARGET_BLOCK_ELEMS elems per block, multiple of 8 rows,
    and >= 2 grid steps when possible so v7x can shard the parallel axis
    across both TensorCores."""
    if rows <= _SUBLANES:
        return rows
    target = max(
        _SUBLANES, (_TARGET_BLOCK_ELEMS // width) // _SUBLANES * _SUBLANES
    )
    tr = min(rows, target)
    if tr >= rows:
        # Whole problem would be one grid step: split it in two (rounded to
        # a sublane multiple; the ragged tail block is handled by Pallas).
        half = -(-rows // 2)
        tr = -(-half // _SUBLANES) * _SUBLANES
    return tr


def _run_tiled(x2, y2, c2):
    """x2, y2: (rows, width); c2: (1, width). Grid over rows."""
    rows, width = x2.shape
    tr = _choose_tile_rows(rows, width)
    grid = (pl.cdiv(rows, tr),)
    return pl.pallas_call(
        _res_eventually_kernel,
        out_shape=jax.ShapeDtypeStruct((rows, width), x2.dtype),
        grid=grid,
        in_specs=[
            pl.BlockSpec((tr, width), lambda i: (i, 0)),
            pl.BlockSpec((tr, width), lambda i: (i, 0)),
            pl.BlockSpec((1, width), lambda i: (0, 0)),  # folded constant, resident
        ],
        out_specs=pl.BlockSpec((tr, width), lambda i: (i, 0)),
        compiler_params=pltpu.CompilerParams(
            dimension_semantics=("parallel",),
            vmem_limit_bytes=_VMEM_LIMIT_BYTES,
        ),
    )(x2, y2, c2)


def res_eventually(x, y, beta):
    """x, y: (..., input_size); beta: (input_size,)."""
    assert x.shape == y.shape
    feat = x.shape[-1]
    assert beta.shape == (feat,)
    orig_shape = x.shape

    total = 1
    for d in orig_shape:
        total *= int(d)

    # Fold the constants once (tiny (feat,) op in the wrapper):
    # out = max(x + y + c, 0), c = 1 - beta.
    c = (1.0 - beta).astype(x.dtype)

    # Lane-dense flattening width: smallest width keeping feature alignment is
    # lcm(feat, 128); grow it (staying a divisor of total) up to the cap so
    # stores are wide, unmasked vst's.
    lcm_fl = feat * _LANES // math.gcd(feat, _LANES)
    width = None
    if lcm_fl <= _MAX_LANE_WIDTH and total % lcm_fl == 0:
        width = lcm_fl
        while width * 2 <= _MAX_LANE_WIDTH and total % (width * 2) == 0:
            width *= 2

    if width is not None:
        rows = total // width
        x2 = x.reshape(rows, width)
        y2 = y.reshape(rows, width)
        # width % feat == 0, so tiling c keeps every flattened position j
        # aligned with feature j % feat.
        c2 = jnp.tile(c, width // feat).reshape(1, width)
    else:
        # Fallback: feature axis on lanes as-is (masked stores if feat is not
        # a multiple of 128, but always valid/compilable).
        rows = total // feat
        x2 = x.reshape(rows, feat)
        y2 = y.reshape(rows, feat)
        c2 = c.reshape(1, feat)

    out = _run_tiled(x2, y2, c2)
    return out.reshape(orig_shape)


def _reference(x, y, beta):
    inp = x + y
    row_sum = beta - inp
    r = jnp.maximum(1.0 - row_sum, 0.0)
    return jnp.where(r >= 0.0, r, 0.02 * r)


if __name__ == "__main__":
    input_size = 16
    batch, seq = 2, 8

    key = jax.random.PRNGKey(0)
    kx, ky, kb = jax.random.split(key, 3)
    x = jax.random.normal(kx, (batch, seq, input_size), dtype=jnp.float32)
    y = jax.random.normal(ky, (batch, seq, input_size), dtype=jnp.float32)
    # Deterministic init of the learnable parameter beta (torch.randn analogue).
    beta = jax.random.normal(kb, (input_size,), dtype=jnp.float32)

    out = jax.block_until_ready(res_eventually(x, y, beta))
    assert out.shape == (batch, seq, input_size)
    assert jnp.allclose(out, _reference(x, y, beta), atol=1e-5, rtol=1e-5), \
        "mismatch vs reference (small shape)"

    # Exercise the wide lane-dense path with >= 2 grid steps (dual-TC sharding).
    xb = jax.random.normal(kx, (4, 256, input_size), dtype=jnp.float32)
    yb = jax.random.normal(ky, (4, 256, input_size), dtype=jnp.float32)
    outb = jax.block_until_ready(res_eventually(xb, yb, beta))
    assert jnp.allclose(outb, _reference(xb, yb, beta), atol=1e-5, rtol=1e-5), \
        "mismatch vs reference (multi-step shape)"

    # Exercise the non-lane-dense fallback (feature size not compatible with lcm path).
    feat_odd = 17
    beta_odd = jax.random.normal(kb, (feat_odd,), dtype=jnp.float32)
    xo = jax.random.normal(kx, (2, 8, feat_odd), dtype=jnp.float32)
    yo = jax.random.normal(ky, (2, 8, feat_odd), dtype=jnp.float32)
    outo = jax.block_until_ready(res_eventually(xo, yo, beta_odd))
    assert jnp.allclose(outo, _reference(xo, yo, beta_odd), atol=1e-5, rtol=1e-5), \
        "mismatch vs reference (fallback shape)"

    print("KERNEL_OK")
</pallas_src>

<mosaic_0001>
module attributes {stable_mosaic.version = 11 : i64} {
  func.func @_res_eventually_kernel(%arg0: i32, %arg1: memref<1x256xf32, #tpu.memory_space<vmem>>, %arg2: memref<1x256xf32, #tpu.memory_space<vmem>>, %arg3: memref<1x256xf32, #tpu.memory_space<vmem>>, %arg4: memref<1x256xf32, #tpu.memory_space<vmem>>) attributes {dimension_semantics = [#tpu.dimension_semantics<parallel>], iteration_bounds = array<i64: 1>, scalar_prefetch = 0 : i64, scratch_operands = 0 : i64, tpu.core_type = #tpu.core_type<tc>, window_params = [{transform_indices = @transform_0, window_bounds = array<i64: 1, 256>}, {transform_indices = @transform_1, window_bounds = array<i64: 1, 256>}, {pipeline_mode = #tpu.pipeline_mode<synchronous>, transform_indices = @transform_2, window_bounds = array<i64: 1, 256>}, {transform_indices = @transform_3, window_bounds = array<i64: 1, 256>}]} {
    %c0 = arith.constant 0 : index
    %c0_0 = arith.constant 0 : index
    %0 = vector.load %arg1[%c0, %c0_0] : memref<1x256xf32, #tpu.memory_space<vmem>>, vector<1x256xf32>
    %c0_1 = arith.constant 0 : index
    %c0_2 = arith.constant 0 : index
    %1 = vector.load %arg2[%c0_1, %c0_2] : memref<1x256xf32, #tpu.memory_space<vmem>>, vector<1x256xf32>
    %2 = arith.addf %0, %1 : vector<1x256xf32>
    %c0_3 = arith.constant 0 : index
    %c0_4 = arith.constant 0 : index
    %3 = vector.load %arg3[%c0_3, %c0_4] : memref<1x256xf32, #tpu.memory_space<vmem>>, vector<1x256xf32>
    %4 = arith.addf %2, %3 : vector<1x256xf32>
    %cst = arith.constant 0.000000e+00 : f32
    %5 = vector.broadcast %cst : f32 to vector<1x256xf32>
    %6 = arith.maximumf %4, %5 : vector<1x256xf32>
    %c0_5 = arith.constant 0 : index
    %c0_6 = arith.constant 0 : index
    %7 = vector.load %arg4[%c0_5, %c0_6] : memref<1x256xf32, #tpu.memory_space<vmem>>, vector<1x256xf32>
    tpu.vector_store %arg4[%c0_5, %c0_6], %6 {strides = array<i32>} : memref<1x256xf32, #tpu.memory_space<vmem>>, vector<1x256xf32>,
    return
  }
  func.func @transform_0(%arg0: i32) -> (i32, i32) {
    %c0_i32 = arith.constant 0 : i32
    %c0_i32_0 = arith.constant 0 : i32
    return %arg0, %c0_i32 : i32, i32
  }
  func.func @transform_1(%arg0: i32) -> (i32, i32) {
    %c0_i32 = arith.constant 0 : i32
    %c0_i32_0 = arith.constant 0 : i32
    return %arg0, %c0_i32 : i32, i32
  }
  func.func @transform_2(%arg0: i32) -> (i32, i32) {
    %c0_i32 = arith.constant 0 : i32
    %c0_i32_0 = arith.constant 0 : i32
    %c0_i32_1 = arith.constant 0 : i32
    return %c0_i32, %c0_i32_0 : i32, i32
  }
  func.func @transform_3(%arg0: i32) -> (i32, i32) {
    %c0_i32 = arith.constant 0 : i32
    %c0_i32_0 = arith.constant 0 : i32
    return %arg0, %c0_i32 : i32, i32
  }
}

</mosaic_0001>

<bundles_post_ra>
// kernel: tpu_custom_call.1
= control target key start
LH: loop header
LB: loop body
LE: loop exit
PB: predicated region body
PF: predicated region fallthrough
CT: control target
= control target key end

     0   :  { %8 = vsyncpa [#allocation3], 0  ;;  %s227_s0 = inlined_call_operand.hbm [shape: f32[1,256], index: 0, kind: input, shape index: {}]   ;;  %s228_s1 = inlined_call_operand.hbm [shape: f32[1,256], index: 1, kind: input, shape index: {}]   ;;  %s229_s2 = inlined_call_operand.hbm [shape: f32[1,256], index: 2, kind: input, shape index: {}]   ;;  %s230_s3 = inlined_call_operand.hbm [shape: f32[1,256], index: 3, kind: output, shape index: {}]  }
   0x1   :  { %9 = vsyncpa [#allocation6], 0  ;;  %s27_s14 = sshll.u32 %s228_s1, 4  ;;  %s28_s14 = int_to_ptr.hbm [resolvable:$true] %s27_s14 }
   0x2   :  { %10 = vsyncpa [#allocation4], 0  ;;  %s191_s15 = smov [#allocation5]   ;;  %s16_s19 = sshll.u32 %s227_s0, 4  ;;  %s17_s19 = int_to_ptr.hbm [resolvable:$true] %s16_s19 }
   0x3   :  { %s29_s16 = sshll.u32 %s191_s15, 4  ;;  %s192_s20 = smov [#allocation2]   ;;  %s30_s16 = int_to_ptr.vmem [resolvable:$true] %s29_s16 }
   0x4   :  { %32 = dma.hbm_to_vmem [thread:$0]  %s28_s14, 32, %s30_s16, [#allocation6]  }
   0x5   :  { %s18_s21 = sshll.u32 %s192_s20, 4  ;;  %s38_s24 = sshll.u32 %s229_s2, 4  ;;  %s19_s21 = int_to_ptr.vmem [resolvable:$true] %s18_s21  ;;  %s39_s24 = int_to_ptr.hbm [resolvable:$true] %s38_s24 }
   0x6   :  { %21 = dma.hbm_to_vmem [thread:$0]  %s17_s19, 32, %s19_s21, [#allocation3]  }
   0x7   :  { %s193_s1 = smov [#allocation7]  }
   0x8   :  { %s40_s25 = sshll.u32 %s193_s1, 4  ;;  %s41_s25 = int_to_ptr.vmem [resolvable:$true] %s40_s25 }
   0x9   :  { %43 = dma.hbm_to_vmem [thread:$0]  %s39_s24, 32, %s41_s25, [#allocation6]  }
   0xa   :  { %185 = dma.done.wait [#allocation3], 32  }
   0xb   :  { %186 = vsyncadd [#allocation3], 4294967264 }
   0xc   :  { %187 = dma.done.wait [#allocation6], 64  }
   0xd   :  { %188 = vsyncadd [#allocation6], 4294967232  ;;  %v56_v0 = vld [vmem:[#allocation2] sm:$0x3]  ;;  %v57_v1 = vld [vmem:[#allocation5] sm:$0x3]  ;;  %v62_v3 = vlaneseq }
   0xe   :  { %v59_v2 = vld [vmem:[#allocation7] sm:$0x3]  ;;  %v58_v4 = vadd.f32 %v57_v1, %v56_v0  ;;  %s194_s0 = smov [#allocation8]   ;;  %s74_s28 = sshll.u32 %s230_s3, 4  ;;  %s75_s28 = int_to_ptr.hbm [resolvable:$true] %s74_s28 }
   0xf   :  { %s72_s26 = sshll.u32 %s194_s0, 4  ;;  %vm64_vm0 = vcmp.lt.s32.totalorder %v62_v3, 256  ;;  %s73_s26 = int_to_ptr.vmem [resolvable:$true] %s72_s26 }
  0x10   :  { %v60_v5 = vadd.f32 %v59_v2, %v58_v4 }
  0x12   :  { %v61_v6 = vmax.f32 %v60_v5, 0.0 }
  0x14   :  { %66 = vst.msk [vmem:[#allocation8] sm:$0x3] %vm64_vm0, %v61_v6 }
  0x15   :  { %77 = dma.vmem_to_hbm [thread:$0]  %s73_s26, 32, %s75_s28, [#allocation4]  }
  0x16   :  { %189 = dma.done.wait [#allocation4], 32  }
  0x17   :  { %190 = vsyncadd [#allocation4], 4294967264 }
  0x18   :  { %82 = vsyncpa [#allocation3], 1 }
  0x19   :  { %83 = vsyncpa [#allocation6], 1 }
  0x1a   :  { %84 = vsyncpa [#allocation4], 1 }

</bundles_post_ra>
